<compile_context>
chip_gen: v6e
topology: v6e:2x2x1
jax: 0.10.0
libtpu: 0.0.40
codegen_flags: <defaults>
</compile_context>

<pallas_src>
import functools

import jax
import jax.numpy as jnp
from jax.experimental import pallas as pl
from jax.experimental.pallas import tpu as pltpu


def _resblock_pass_kernel(*refs, mode, l_valid):
    """Shared body for the three passes.

    refs layout (inputs then outputs):
      mode 0: x, w1                      | mu1, m2_1
      mode 1: x, w1, s1, t1, w2          | mu2, m2_2
      mode 2: x, w1, s1, t1, w2, s2, t2  | out
    x      : (1, C, Lp) f32  one batch element, length lane-padded to 128
    wX     : (3, C, C) bf16  conv taps (k=0 -> left, k=1 -> center, k=2 -> right)
    sX/tX  : (C, 1)   f32    folded BatchNorm scale / shift
    muX/m2X: (1, C, 1) f32   per-tile mean / mean-shifted sum of squares
    """
    x_ref, w1_ref = refs[0], refs[1]
    x = x_ref[0]                                   # (C, Lp) f32
    lp = x.shape[1]
    pad = lp - l_valid                             # static python int
    lane = jax.lax.broadcasted_iota(jnp.int32, (1, lp), 1)
    inv_n = 1.0 / float(l_valid)

    def conv3(h, w_ref):
        # out[:, j] = W0 @ h[:, j-1] + W1 @ h[:, j] + W2 @ h[:, j+1] (zero pad=1).
        # Wrap columns of the rolls are forced to the conv's zero padding, so
        # this is correct whether or not L is a multiple of 128.
        h_m1 = jnp.where(lane == 0, 0.0, pltpu.roll(h, 1, 1))
        h_p1 = jnp.where(lane == lp - 1, 0.0, pltpu.roll(h, lp - 1, 1))
        acc = jnp.dot(w_ref[1], h.astype(jnp.bfloat16),
                      preferred_element_type=jnp.float32)
        acc = acc + jnp.dot(w_ref[0], h_m1.astype(jnp.bfloat16),
                            preferred_element_type=jnp.float32)
        acc = acc + jnp.dot(w_ref[2], h_p1.astype(jnp.bfloat16),
                            preferred_element_type=jnp.float32)
        return acc

    def tile_stats(h, mu_ref, m2_ref):
        # Mean-shifted (Chan-combinable) statistics over valid lanes only.
        hv = jnp.where(lane < l_valid, h, 0.0) if pad else h
        mu = jnp.sum(hv, axis=1, keepdims=True) * inv_n        # (C, 1)
        d = h - mu
        if pad:
            d = jnp.where(lane < l_valid, d, 0.0)
        m2 = jnp.sum(d * d, axis=1, keepdims=True)             # (C, 1)
        mu_ref[0] = mu
        m2_ref[0] = m2

    h1 = conv3(x, w1_ref)
    if mode == 0:
        tile_stats(h1, refs[2], refs[3])
        return

    s1, t1, w2_ref = refs[2][...], refs[3][...], refs[4]
    y1 = jnp.maximum(h1 * s1 + t1, 0.0)            # folded BN1 + ReLU
    if pad:
        y1 = jnp.where(lane < l_valid, y1, 0.0)    # restore conv2's zero padding
    h2 = conv3(y1, w2_ref)

    if mode == 1:
        tile_stats(h2, refs[5], refs[6])
        return

    s2, t2, o_ref = refs[5][...], refs[6][...], refs[7]
    o_ref[0] = x + h2 * s2 + t2                    # folded BN2 + residual


def _round_up(v, m):
    return ((v + m - 1) // m) * m


def _prep_weight(w_oik):
    """PyTorch Conv1d weight (Cout, Cin, K=3) -> (K, Cout, Cin) bf16 tap stack."""
    return jnp.transpose(w_oik.astype(jnp.float32), (2, 0, 1)).astype(jnp.bfloat16)


def _fold_bn(mu_p, m2_p, gamma, beta, n_per_tile, eps):
    """Chan-combine per-tile (mean, M2) partials, fold BN into scale/shift."""
    mu_t = mu_p[:, :, 0]                           # (N, C)
    m2_t = m2_p[:, :, 0]
    n_tiles = mu_t.shape[0]
    mu = jnp.mean(mu_t, axis=0)                    # (C,)
    var = (jnp.sum(m2_t, axis=0) / (n_tiles * n_per_tile)
           + jnp.mean((mu_t - mu[None, :]) ** 2, axis=0))   # biased batch variance
    scale = gamma.astype(jnp.float32) * jax.lax.rsqrt(var + eps)
    shift = beta.astype(jnp.float32) - mu * scale
    return scale.reshape(-1, 1), shift.reshape(-1, 1)


def _vmem_limit_bytes(tile_bytes, weight_bytes):
    try:
        cap = int(pltpu.get_tpu_info().vmem_capacity_bytes)
    except Exception:                              # interpret mode / old runtimes
        cap = 64 * 2**20                           # conservative (v7x per-TC)
    # x + out double-buffered plus ~10 live f32 temporaries per tile + weights.
    need = 14 * tile_bytes + 4 * weight_bytes + (2 << 20)
    return int(min(int(cap * 0.85), max(32 << 20, need)))


@functools.partial(jax.jit, static_argnames=("eps",))
def residual_block_1d(x_ncl, params, eps=1e-5):
    """x_ncl: (N, C, L) f32 -> (N, C, L) f32 (fresh-module == training-mode BN)."""
    n, c, l = x_ncl.shape
    l_pad = _round_up(l, 128)

    x = x_ncl.astype(jnp.float32)
    if l_pad != l:
        x = jnp.pad(x, ((0, 0), (0, 0), (0, l_pad - l)))

    w1 = _prep_weight(params["w1"])
    w2 = _prep_weight(params["w2"])
    # NOTE: conv biases params["b1"]/["b2"] are intentionally unused: a per-channel
    # constant is removed exactly by training-mode BatchNorm's mean subtraction.

    x_spec = pl.BlockSpec((1, c, l_pad), lambda i: (i, 0, 0))
    w_spec = pl.BlockSpec((3, c, c), lambda i: (0, 0, 0))
    vec_spec = pl.BlockSpec((c, 1), lambda i: (0, 0))
    stat_spec = pl.BlockSpec((1, c, 1), lambda i: (i, 0, 0))
    stat_shape = jax.ShapeDtypeStruct((n, c, 1), jnp.float32)

    tile_bytes = c * l_pad * 4
    weight_bytes = 3 * c * c * 2
    cparams = pltpu.CompilerParams(
        dimension_semantics=("parallel",),          # v7x megacore: batch-sharded
        vmem_limit_bytes=_vmem_limit_bytes(tile_bytes, weight_bytes))

    conv_flops = 2 * 3 * c * c * l_pad              # one conv layer, one tile

    def cost(n_convs, out_bytes):
        return pl.CostEstimate(flops=n * n_convs * conv_flops, transcendentals=0,
                               bytes_accessed=int(n * tile_bytes + out_bytes))

    # Pass 1: conv1 -> per-batch-element BN1 partial statistics.
    mu1, m2_1 = pl.pallas_call(
        functools.partial(_resblock_pass_kernel, mode=0, l_valid=l),
        grid=(n,),
        in_specs=[x_spec, w_spec],
        out_specs=(stat_spec, stat_spec),
        out_shape=(stat_shape, stat_shape),
        compiler_params=cparams,
        cost_estimate=cost(1, 2 * n * c * 4),
    )(x, w1)
    s1, t1 = _fold_bn(mu1, m2_1, params["g1"], params["be1"], l, eps)

    # Pass 2: conv1 -> BN1 -> ReLU -> conv2 -> per-batch BN2 partial statistics.
    mu2, m2_2 = pl.pallas_call(
        functools.partial(_resblock_pass_kernel, mode=1, l_valid=l),
        grid=(n,),
        in_specs=[x_spec, w_spec, vec_spec, vec_spec, w_spec],
        out_specs=(stat_spec, stat_spec),
        out_shape=(stat_shape, stat_shape),
        compiler_params=cparams,
        cost_estimate=cost(2, 2 * n * c * 4),
    )(x, w1, s1, t1, w2)
    s2, t2 = _fold_bn(mu2, m2_2, params["g2"], params["be2"], l, eps)

    # Pass 3: full block + folded BN2 + residual; lane-dense (C, L_pad) stores.
    out = pl.pallas_call(
        functools.partial(_resblock_pass_kernel, mode=2, l_valid=l),
        grid=(n,),
        in_specs=[x_spec, w_spec, vec_spec, vec_spec, w_spec, vec_spec, vec_spec],
        out_specs=x_spec,
        out_shape=jax.ShapeDtypeStruct((n, c, l_pad), jnp.float32),
        compiler_params=cparams,
        cost_estimate=cost(2, n * tile_bytes),
    )(x, w1, s1, t1, w2, s2, t2)

    return out[:, :, :l] if l_pad != l else out


def _reference(x, params, eps=1e-5):
    """Pure-JAX training-mode forward matching PyTorch semantics, with the conv
    operands rounded to bf16 (f32 accumulation) to mirror the kernel's MXU
    input precision.  Conv biases are kept here (they cancel under BN)."""
    def conv1d(h, w, b):
        y = jax.lax.conv_general_dilated(
            h.astype(jnp.bfloat16), w.astype(jnp.bfloat16),
            window_strides=(1,), padding=((1, 1),),
            dimension_numbers=("NCH", "OIH", "NCH"),
            preferred_element_type=jnp.float32)
        return y + b[None, :, None]

    def bn(y, g, be):
        mu = jnp.mean(y, axis=(0, 2), keepdims=True)
        var = jnp.mean((y - mu) ** 2, axis=(0, 2), keepdims=True)
        return (y - mu) / jnp.sqrt(var + eps) * g[None, :, None] + be[None, :, None]

    h = conv1d(x, params["w1"], params["b1"])
    h = jnp.maximum(bn(h, params["g1"], params["be1"]), 0.0)
    h = conv1d(h, params["w2"], params["b2"])
    h = bn(h, params["g2"], params["be2"])
    return x + h


def make_params(key, channels, kernel_size=3):
    k1, k2, k3, k4 = jax.random.split(key, 4)
    c, k = channels, kernel_size
    return {
        "w1": 0.2 * jax.random.normal(k1, (c, c, k), jnp.float32),
        "b1": 0.1 * jax.random.normal(k2, (c,), jnp.float32),
        "g1": jnp.ones((c,), jnp.float32),    # BatchNorm1d default weight
        "be1": jnp.zeros((c,), jnp.float32),  # BatchNorm1d default bias
        "w2": 0.2 * jax.random.normal(k3, (c, c, k), jnp.float32),
        "b2": 0.1 * jax.random.normal(k4, (c,), jnp.float32),
        "g2": jnp.ones((c,), jnp.float32),
        "be2": jnp.zeros((c,), jnp.float32),
    }


if __name__ == "__main__":
    key = jax.random.PRNGKey(0)
    kx, kp = jax.random.split(key)

    N, C, L = 2, 4, 16  # (batch, channels, length) -- PyTorch Conv1d NCL layout
    x = jax.random.normal(kx, (N, C, L), jnp.float32)
    params = make_params(kp, channels=C, kernel_size=3)

    out = jax.block_until_ready(residual_block_1d(x, params))
    ref = _reference(x, params)

    assert out.shape == (N, C, L)
    max_err = float(jnp.max(jnp.abs(out - ref)))
    assert jnp.allclose(out, ref, rtol=1e-2, atol=1e-2), f"max abs err {max_err}"
    print("KERNEL_OK")
</pallas_src>

<mosaic_0001>
module attributes {stable_mosaic.version = 11 : i64} {
  func.func @_resblock_pass_kernel(%arg0: i32, %arg1: memref<1x4x128xf32, #tpu.memory_space<vmem>>, %arg2: memref<3x4x4xbf16, #tpu.memory_space<vmem>>, %arg3: memref<1x4x1xf32, #tpu.memory_space<vmem>>, %arg4: memref<1x4x1xf32, #tpu.memory_space<vmem>>) attributes {dimension_semantics = [#tpu.dimension_semantics<parallel>], iteration_bounds = array<i64: 2>, scalar_prefetch = 0 : i64, scratch_operands = 0 : i64, tpu.core_type = #tpu.core_type<tc>, window_params = [{transform_indices = @transform_0, window_bounds = array<i64: 1, 4, 128>}, {pipeline_mode = #tpu.pipeline_mode<synchronous>, transform_indices = @transform_1, window_bounds = array<i64: 3, 4, 4>}, {transform_indices = @transform_2, window_bounds = array<i64: 1, 4, 1>}, {transform_indices = @transform_3, window_bounds = array<i64: 1, 4, 1>}]} {
    %c0 = arith.constant 0 : index
    %c0_0 = arith.constant 0 : index
    %c0_1 = arith.constant 0 : index
    %0 = vector.load %arg1[%c0, %c0_0, %c0_1] : memref<1x4x128xf32, #tpu.memory_space<vmem>>, vector<1x4x128xf32>
    %1 = vector.shape_cast %0 : vector<1x4x128xf32> to vector<4x128xf32>
    %2 = tpu.iota {dimensions = array<i32: 1>} : vector<1x128xi32>
    %c0_i32 = arith.constant 0 : i32
    %3 = vector.broadcast %c0_i32 : i32 to vector<1x128xi32>
    %4 = arith.cmpi eq, %2, %3 : vector<1x128xi32>
    %c1_i32 = arith.constant 1 : i32
    %5 = tpu.dynamic_rotate %1 by %c1_i32 dim 1 : vector<4x128xf32>, i32 -> vector<4x128xf32>
    %cst = arith.constant 0.000000e+00 : f32
    %6 = vector.shape_cast %4 : vector<1x128xi1> to vector<1x128xi1>
    %7 = vector.broadcast %6 : vector<1x128xi1> to vector<4x128xi1>
    %8 = vector.broadcast %cst : f32 to vector<4x128xf32>
    %9 = arith.select %7, %8, %5 : vector<4x128xi1>, vector<4x128xf32>
    %c127_i32 = arith.constant 127 : i32
    %10 = vector.broadcast %c127_i32 : i32 to vector<1x128xi32>
    %11 = arith.cmpi eq, %2, %10 : vector<1x128xi32>
    %c127_i32_2 = arith.constant 127 : i32
    %12 = tpu.dynamic_rotate %1 by %c127_i32_2 dim 1 : vector<4x128xf32>, i32 -> vector<4x128xf32>
    %cst_3 = arith.constant 0.000000e+00 : f32
    %13 = vector.shape_cast %11 : vector<1x128xi1> to vector<1x128xi1>
    %14 = vector.broadcast %13 : vector<1x128xi1> to vector<4x128xi1>
    %15 = vector.broadcast %cst_3 : f32 to vector<4x128xf32>
    %16 = arith.select %14, %15, %12 : vector<4x128xi1>, vector<4x128xf32>
    %c1 = arith.constant 1 : index
    %c0_4 = arith.constant 0 : index
    %c0_5 = arith.constant 0 : index
    %17 = vector.load %arg2[%c1, %c0_4, %c0_5] : memref<3x4x4xbf16, #tpu.memory_space<vmem>>, vector<1x4x4xbf16>
    %18 = vector.shape_cast %17 : vector<1x4x4xbf16> to vector<4x4xbf16>
    %19 = arith.truncf %1 : vector<4x128xf32> to vector<4x128xbf16>
    %cst_6 = arith.constant dense<0.000000e+00> : vector<4x128xf32>
    %20 = tpu.matmul %18, %19, %cst_6 {dimension_numbers = #tpu.dot_dimension_numbers<[1], [0], [0], [1], [0, 0, 1, 1], [], []>} : vector<4x4xbf16>, vector<4x128xbf16>, vector<4x128xf32> -> vector<4x128xf32>
    %c0_7 = arith.constant 0 : index
    %c0_8 = arith.constant 0 : index
    %c0_9 = arith.constant 0 : index
    %21 = vector.load %arg2[%c0_7, %c0_8, %c0_9] : memref<3x4x4xbf16, #tpu.memory_space<vmem>>, vector<1x4x4xbf16>
    %22 = vector.shape_cast %21 : vector<1x4x4xbf16> to vector<4x4xbf16>
    %23 = arith.truncf %9 : vector<4x128xf32> to vector<4x128xbf16>
    %cst_10 = arith.constant dense<0.000000e+00> : vector<4x128xf32>
    %24 = tpu.matmul %22, %23, %cst_10 {dimension_numbers = #tpu.dot_dimension_numbers<[1], [0], [0], [1], [0, 0, 1, 1], [], []>} : vector<4x4xbf16>, vector<4x128xbf16>, vector<4x128xf32> -> vector<4x128xf32>
    %25 = arith.addf %20, %24 : vector<4x128xf32>
    %c2 = arith.constant 2 : index
    %c0_11 = arith.constant 0 : index
    %c0_12 = arith.constant 0 : index
    %26 = vector.load %arg2[%c2, %c0_11, %c0_12] : memref<3x4x4xbf16, #tpu.memory_space<vmem>>, vector<1x4x4xbf16>
    %27 = vector.shape_cast %26 : vector<1x4x4xbf16> to vector<4x4xbf16>
    %28 = arith.truncf %16 : vector<4x128xf32> to vector<4x128xbf16>
    %cst_13 = arith.constant dense<0.000000e+00> : vector<4x128xf32>
    %29 = tpu.matmul %27, %28, %cst_13 {dimension_numbers = #tpu.dot_dimension_numbers<[1], [0], [0], [1], [0, 0, 1, 1], [], []>} : vector<4x4xbf16>, vector<4x128xbf16>, vector<4x128xf32> -> vector<4x128xf32>
    %30 = arith.addf %25, %29 : vector<4x128xf32>
    %c16_i32 = arith.constant 16 : i32
    %31 = vector.broadcast %c16_i32 : i32 to vector<1x128xi32>
    %32 = arith.cmpi slt, %2, %31 : vector<1x128xi32>
    %cst_14 = arith.constant 0.000000e+00 : f32
    %33 = vector.shape_cast %32 : vector<1x128xi1> to vector<1x128xi1>
    %34 = vector.broadcast %33 : vector<1x128xi1> to vector<4x128xi1>
    %35 = vector.broadcast %cst_14 : f32 to vector<4x128xf32>
    %36 = arith.select %34, %30, %35 : vector<4x128xi1>, vector<4x128xf32>
    %cst_15 = arith.constant dense<0.000000e+00> : vector<4xf32>
    %37 = vector.multi_reduction <add>, %36, %cst_15 [1] : vector<4x128xf32> to vector<4xf32>
    %38 = vector.shape_cast %37 : vector<4xf32> to vector<4x1xf32>
    %cst_16 = arith.constant 6.250000e-02 : f32
    %39 = vector.broadcast %cst_16 : f32 to vector<4x1xf32>
    %40 = arith.mulf %38, %39 : vector<4x1xf32>
    %41 = vector.broadcast %40 : vector<4x1xf32> to vector<4x128xf32>
    %42 = arith.subf %30, %41 : vector<4x128xf32>
    %c16_i32_17 = arith.constant 16 : i32
    %43 = vector.broadcast %c16_i32_17 : i32 to vector<1x128xi32>
    %44 = arith.cmpi slt, %2, %43 : vector<1x128xi32>
    %cst_18 = arith.constant 0.000000e+00 : f32
    %45 = vector.shape_cast %44 : vector<1x128xi1> to vector<1x128xi1>
    %46 = vector.broadcast %45 : vector<1x128xi1> to vector<4x128xi1>
    %47 = vector.broadcast %cst_18 : f32 to vector<4x128xf32>
    %48 = arith.select %46, %42, %47 : vector<4x128xi1>, vector<4x128xf32>
    %49 = arith.mulf %48, %48 : vector<4x128xf32>
    %cst_19 = arith.constant dense<0.000000e+00> : vector<4xf32>
    %50 = vector.multi_reduction <add>, %49, %cst_19 [1] : vector<4x128xf32> to vector<4xf32>
    %51 = vector.shape_cast %50 : vector<4xf32> to vector<4x1xf32>
    %c0_20 = arith.constant 0 : index
    %c0_21 = arith.constant 0 : index
    %c0_22 = arith.constant 0 : index
    %52 = vector.load %arg3[%c0_20, %c0_21, %c0_22] : memref<1x4x1xf32, #tpu.memory_space<vmem>>, vector<1x4x1xf32>
    %53 = vector.shape_cast %52 : vector<1x4x1xf32> to vector<4x1xf32>
    %54 = vector.shape_cast %40 : vector<4x1xf32> to vector<1x4x1xf32>
    tpu.vector_store %arg3[%c0_20, %c0_21, %c0_22], %54 {strides = array<i32>} : memref<1x4x1xf32, #tpu.memory_space<vmem>>, vector<1x4x1xf32>,
    %c0_23 = arith.constant 0 : index
    %c0_24 = arith.constant 0 : index
    %c0_25 = arith.constant 0 : index
    %55 = vector.load %arg4[%c0_23, %c0_24, %c0_25] : memref<1x4x1xf32, #tpu.memory_space<vmem>>, vector<1x4x1xf32>
    %56 = vector.shape_cast %55 : vector<1x4x1xf32> to vector<4x1xf32>
    %57 = vector.shape_cast %51 : vector<4x1xf32> to vector<1x4x1xf32>
    tpu.vector_store %arg4[%c0_23, %c0_24, %c0_25], %57 {strides = array<i32>} : memref<1x4x1xf32, #tpu.memory_space<vmem>>, vector<1x4x1xf32>,
    return
  }
  func.func @transform_0(%arg0: i32) -> (i32, i32, i32) {
    %c0_i32 = arith.constant 0 : i32
    %c0_i32_0 = arith.constant 0 : i32
    %c0_i32_1 = arith.constant 0 : i32
    return %arg0, %c0_i32, %c0_i32_0 : i32, i32, i32
  }
  func.func @transform_1(%arg0: i32) -> (i32, i32, i32) {
    %c0_i32 = arith.constant 0 : i32
    %c0_i32_0 = arith.constant 0 : i32
    %c0_i32_1 = arith.constant 0 : i32
    %c0_i32_2 = arith.constant 0 : i32
    return %c0_i32, %c0_i32_0, %c0_i32_1 : i32, i32, i32
  }
  func.func @transform_2(%arg0: i32) -> (i32, i32, i32) {
    %c0_i32 = arith.constant 0 : i32
    %c0_i32_0 = arith.constant 0 : i32
    %c0_i32_1 = arith.constant 0 : i32
    return %arg0, %c0_i32, %c0_i32_0 : i32, i32, i32
  }
  func.func @transform_3(%arg0: i32) -> (i32, i32, i32) {
    %c0_i32 = arith.constant 0 : i32
    %c0_i32_0 = arith.constant 0 : i32
    %c0_i32_1 = arith.constant 0 : i32
    return %arg0, %c0_i32, %c0_i32_0 : i32, i32, i32
  }
}

module attributes {stable_mosaic.version = 11 : i64} {
  func.func @_resblock_pass_kernel(%arg0: i32, %arg1: memref<1x4x128xf32, #tpu.memory_space<vmem>>, %arg2: memref<3x4x4xbf16, #tpu.memory_space<vmem>>, %arg3: memref<4x1xf32, #tpu.memory_space<vmem>>, %arg4: memref<4x1xf32, #tpu.memory_space<vmem>>, %arg5: memref<3x4x4xbf16, #tpu.memory_space<vmem>>, %arg6: memref<4x1xf32, #tpu.memory_space<vmem>>, %arg7: memref<4x1xf32, #tpu.memory_space<vmem>>, %arg8: memref<1x4x128xf32, #tpu.memory_space<vmem>>) attributes {dimension_semantics = [#tpu.dimension_semantics<parallel>], iteration_bounds = array<i64: 2>, scalar_prefetch = 0 : i64, scratch_operands = 0 : i64, tpu.core_type = #tpu.core_type<tc>, window_params = [{transform_indices = @transform_0, window_bounds = array<i64: 1, 4, 128>}, {pipeline_mode = #tpu.pipeline_mode<synchronous>, transform_indices = @transform_1, window_bounds = array<i64: 3, 4, 4>}, {pipeline_mode = #tpu.pipeline_mode<synchronous>, transform_indices = @transform_2, window_bounds = array<i64: 4, 1>}, {pipeline_mode = #tpu.pipeline_mode<synchronous>, transform_indices = @transform_3, window_bounds = array<i64: 4, 1>}, {pipeline_mode = #tpu.pipeline_mode<synchronous>, transform_indices = @transform_4, window_bounds = array<i64: 3, 4, 4>}, {pipeline_mode = #tpu.pipeline_mode<synchronous>, transform_indices = @transform_5, window_bounds = array<i64: 4, 1>}, {pipeline_mode = #tpu.pipeline_mode<synchronous>, transform_indices = @transform_6, window_bounds = array<i64: 4, 1>}, {transform_indices = @transform_7, window_bounds = array<i64: 1, 4, 128>}]} {
    %c0 = arith.constant 0 : index
    %c0_0 = arith.constant 0 : index
    %c0_1 = arith.constant 0 : index
    %0 = vector.load %arg1[%c0, %c0_0, %c0_1] : memref<1x4x128xf32, #tpu.memory_space<vmem>>, vector<1x4x128xf32>
    %1 = vector.shape_cast %0 : vector<1x4x128xf32> to vector<4x128xf32>
    %2 = tpu.iota {dimensions = array<i32: 1>} : vector<1x128xi32>
    %c0_i32 = arith.constant 0 : i32
    %3 = vector.broadcast %c0_i32 : i32 to vector<1x128xi32>
    %4 = arith.cmpi eq, %2, %3 : vector<1x128xi32>
    %c1_i32 = arith.constant 1 : i32
    %5 = tpu.dynamic_rotate %1 by %c1_i32 dim 1 : vector<4x128xf32>, i32 -> vector<4x128xf32>
    %cst = arith.constant 0.000000e+00 : f32
    %6 = vector.shape_cast %4 : vector<1x128xi1> to vector<1x128xi1>
    %7 = vector.broadcast %6 : vector<1x128xi1> to vector<4x128xi1>
    %8 = vector.broadcast %cst : f32 to vector<4x128xf32>
    %9 = arith.select %7, %8, %5 : vector<4x128xi1>, vector<4x128xf32>
    %c127_i32 = arith.constant 127 : i32
    %10 = vector.broadcast %c127_i32 : i32 to vector<1x128xi32>
    %11 = arith.cmpi eq, %2, %10 : vector<1x128xi32>
    %c127_i32_2 = arith.constant 127 : i32
    %12 = tpu.dynamic_rotate %1 by %c127_i32_2 dim 1 : vector<4x128xf32>, i32 -> vector<4x128xf32>
    %cst_3 = arith.constant 0.000000e+00 : f32
    %13 = vector.shape_cast %11 : vector<1x128xi1> to vector<1x128xi1>
    %14 = vector.broadcast %13 : vector<1x128xi1> to vector<4x128xi1>
    %15 = vector.broadcast %cst_3 : f32 to vector<4x128xf32>
    %16 = arith.select %14, %15, %12 : vector<4x128xi1>, vector<4x128xf32>
    %c1 = arith.constant 1 : index
    %c0_4 = arith.constant 0 : index
    %c0_5 = arith.constant 0 : index
    %17 = vector.load %arg2[%c1, %c0_4, %c0_5] : memref<3x4x4xbf16, #tpu.memory_space<vmem>>, vector<1x4x4xbf16>
    %18 = vector.shape_cast %17 : vector<1x4x4xbf16> to vector<4x4xbf16>
    %19 = arith.truncf %1 : vector<4x128xf32> to vector<4x128xbf16>
    %cst_6 = arith.constant dense<0.000000e+00> : vector<4x128xf32>
    %20 = tpu.matmul %18, %19, %cst_6 {dimension_numbers = #tpu.dot_dimension_numbers<[1], [0], [0], [1], [0, 0, 1, 1], [], []>} : vector<4x4xbf16>, vector<4x128xbf16>, vector<4x128xf32> -> vector<4x128xf32>
    %c0_7 = arith.constant 0 : index
    %c0_8 = arith.constant 0 : index
    %c0_9 = arith.constant 0 : index
    %21 = vector.load %arg2[%c0_7, %c0_8, %c0_9] : memref<3x4x4xbf16, #tpu.memory_space<vmem>>, vector<1x4x4xbf16>
    %22 = vector.shape_cast %21 : vector<1x4x4xbf16> to vector<4x4xbf16>
    %23 = arith.truncf %9 : vector<4x128xf32> to vector<4x128xbf16>
    %cst_10 = arith.constant dense<0.000000e+00> : vector<4x128xf32>
    %24 = tpu.matmul %22, %23, %cst_10 {dimension_numbers = #tpu.dot_dimension_numbers<[1], [0], [0], [1], [0, 0, 1, 1], [], []>} : vector<4x4xbf16>, vector<4x128xbf16>, vector<4x128xf32> -> vector<4x128xf32>
    %25 = arith.addf %20, %24 : vector<4x128xf32>
    %c2 = arith.constant 2 : index
    %c0_11 = arith.constant 0 : index
    %c0_12 = arith.constant 0 : index
    %26 = vector.load %arg2[%c2, %c0_11, %c0_12] : memref<3x4x4xbf16, #tpu.memory_space<vmem>>, vector<1x4x4xbf16>
    %27 = vector.shape_cast %26 : vector<1x4x4xbf16> to vector<4x4xbf16>
    %28 = arith.truncf %16 : vector<4x128xf32> to vector<4x128xbf16>
    %cst_13 = arith.constant dense<0.000000e+00> : vector<4x128xf32>
    %29 = tpu.matmul %27, %28, %cst_13 {dimension_numbers = #tpu.dot_dimension_numbers<[1], [0], [0], [1], [0, 0, 1, 1], [], []>} : vector<4x4xbf16>, vector<4x128xbf16>, vector<4x128xf32> -> vector<4x128xf32>
    %30 = arith.addf %25, %29 : vector<4x128xf32>
    %c0_14 = arith.constant 0 : index
    %c0_15 = arith.constant 0 : index
    %31 = vector.load %arg3[%c0_14, %c0_15] : memref<4x1xf32, #tpu.memory_space<vmem>>, vector<4x1xf32>
    %c0_16 = arith.constant 0 : index
    %c0_17 = arith.constant 0 : index
    %32 = vector.load %arg4[%c0_16, %c0_17] : memref<4x1xf32, #tpu.memory_space<vmem>>, vector<4x1xf32>
    %33 = vector.broadcast %31 : vector<4x1xf32> to vector<4x128xf32>
    %34 = arith.mulf %30, %33 : vector<4x128xf32>
    %35 = vector.broadcast %32 : vector<4x1xf32> to vector<4x128xf32>
    %36 = arith.addf %34, %35 : vector<4x128xf32>
    %cst_18 = arith.constant 0.000000e+00 : f32
    %37 = vector.broadcast %cst_18 : f32 to vector<4x128xf32>
    %38 = arith.maximumf %36, %37 : vector<4x128xf32>
    %c16_i32 = arith.constant 16 : i32
    %39 = vector.broadcast %c16_i32 : i32 to vector<1x128xi32>
    %40 = arith.cmpi slt, %2, %39 : vector<1x128xi32>
    %cst_19 = arith.constant 0.000000e+00 : f32
    %41 = vector.shape_cast %40 : vector<1x128xi1> to vector<1x128xi1>
    %42 = vector.broadcast %41 : vector<1x128xi1> to vector<4x128xi1>
    %43 = vector.broadcast %cst_19 : f32 to vector<4x128xf32>
    %44 = arith.select %42, %38, %43 : vector<4x128xi1>, vector<4x128xf32>
    %c0_i32_20 = arith.constant 0 : i32
    %45 = vector.broadcast %c0_i32_20 : i32 to vector<1x128xi32>
    %46 = arith.cmpi eq, %2, %45 : vector<1x128xi32>
    %c1_i32_21 = arith.constant 1 : i32
    %47 = tpu.dynamic_rotate %44 by %c1_i32_21 dim 1 : vector<4x128xf32>, i32 -> vector<4x128xf32>
    %cst_22 = arith.constant 0.000000e+00 : f32
    %48 = vector.shape_cast %46 : vector<1x128xi1> to vector<1x128xi1>
    %49 = vector.broadcast %48 : vector<1x128xi1> to vector<4x128xi1>
    %50 = vector.broadcast %cst_22 : f32 to vector<4x128xf32>
    %51 = arith.select %49, %50, %47 : vector<4x128xi1>, vector<4x128xf32>
    %c127_i32_23 = arith.constant 127 : i32
    %52 = vector.broadcast %c127_i32_23 : i32 to vector<1x128xi32>
    %53 = arith.cmpi eq, %2, %52 : vector<1x128xi32>
    %c127_i32_24 = arith.constant 127 : i32
    %54 = tpu.dynamic_rotate %44 by %c127_i32_24 dim 1 : vector<4x128xf32>, i32 -> vector<4x128xf32>
    %cst_25 = arith.constant 0.000000e+00 : f32
    %55 = vector.shape_cast %53 : vector<1x128xi1> to vector<1x128xi1>
    %56 = vector.broadcast %55 : vector<1x128xi1> to vector<4x128xi1>
    %57 = vector.broadcast %cst_25 : f32 to vector<4x128xf32>
    %58 = arith.select %56, %57, %54 : vector<4x128xi1>, vector<4x128xf32>
    %c1_26 = arith.constant 1 : index
    %c0_27 = arith.constant 0 : index
    %c0_28 = arith.constant 0 : index
    %59 = vector.load %arg5[%c1_26, %c0_27, %c0_28] : memref<3x4x4xbf16, #tpu.memory_space<vmem>>, vector<1x4x4xbf16>
    %60 = vector.shape_cast %59 : vector<1x4x4xbf16> to vector<4x4xbf16>
    %61 = arith.truncf %44 : vector<4x128xf32> to vector<4x128xbf16>
    %cst_29 = arith.constant dense<0.000000e+00> : vector<4x128xf32>
    %62 = tpu.matmul %60, %61, %cst_29 {dimension_numbers = #tpu.dot_dimension_numbers<[1], [0], [0], [1], [0, 0, 1, 1], [], []>} : vector<4x4xbf16>, vector<4x128xbf16>, vector<4x128xf32> -> vector<4x128xf32>
    %c0_30 = arith.constant 0 : index
    %c0_31 = arith.constant 0 : index
    %c0_32 = arith.constant 0 : index
    %63 = vector.load %arg5[%c0_30, %c0_31, %c0_32] : memref<3x4x4xbf16, #tpu.memory_space<vmem>>, vector<1x4x4xbf16>
    %64 = vector.shape_cast %63 : vector<1x4x4xbf16> to vector<4x4xbf16>
    %65 = arith.truncf %51 : vector<4x128xf32> to vector<4x128xbf16>
    %cst_33 = arith.constant dense<0.000000e+00> : vector<4x128xf32>
    %66 = tpu.matmul %64, %65, %cst_33 {dimension_numbers = #tpu.dot_dimension_numbers<[1], [0], [0], [1], [0, 0, 1, 1], [], []>} : vector<4x4xbf16>, vector<4x128xbf16>, vector<4x128xf32> -> vector<4x128xf32>
    %67 = arith.addf %62, %66 : vector<4x128xf32>
    %c2_34 = arith.constant 2 : index
    %c0_35 = arith.constant 0 : index
    %c0_36 = arith.constant 0 : index
    %68 = vector.load %arg5[%c2_34, %c0_35, %c0_36] : memref<3x4x4xbf16, #tpu.memory_space<vmem>>, vector<1x4x4xbf16>
    %69 = vector.shape_cast %68 : vector<1x4x4xbf16> to vector<4x4xbf16>
    %70 = arith.truncf %58 : vector<4x128xf32> to vector<4x128xbf16>
    %cst_37 = arith.constant dense<0.000000e+00> : vector<4x128xf32>
    %71 = tpu.matmul %69, %70, %cst_37 {dimension_numbers = #tpu.dot_dimension_numbers<[1], [0], [0], [1], [0, 0, 1, 1], [], []>} : vector<4x4xbf16>, vector<4x128xbf16>, vector<4x128xf32> -> vector<4x128xf32>
    %72 = arith.addf %67, %71 : vector<4x128xf32>
    %c0_38 = arith.constant 0 : index
    %c0_39 = arith.constant 0 : index
    %73 = vector.load %arg6[%c0_38, %c0_39] : memref<4x1xf32, #tpu.memory_space<vmem>>, vector<4x1xf32>
    %c0_40 = arith.constant 0 : index
    %c0_41 = arith.constant 0 : index
    %74 = vector.load %arg7[%c0_40, %c0_41] : memref<4x1xf32, #tpu.memory_space<vmem>>, vector<4x1xf32>
    %75 = vector.broadcast %73 : vector<4x1xf32> to vector<4x128xf32>
    %76 = arith.mulf %72, %75 : vector<4x128xf32>
    %77 = arith.addf %1, %76 : vector<4x128xf32>
    %78 = vector.broadcast %74 : vector<4x1xf32> to vector<4x128xf32>
    %79 = arith.addf %77, %78 : vector<4x128xf32>
    %c0_42 = arith.constant 0 : index
    %c0_43 = arith.constant 0 : index
    %c0_44 = arith.constant 0 : index
    %80 = vector.load %arg8[%c0_42, %c0_43, %c0_44] : memref<1x4x128xf32, #tpu.memory_space<vmem>>, vector<1x4x128xf32>
    %81 = vector.shape_cast %80 : vector<1x4x128xf32> to vector<4x128xf32>
    %82 = vector.shape_cast %79 : vector<4x128xf32> to vector<1x4x128xf32>
    tpu.vector_store %arg8[%c0_42, %c0_43, %c0_44], %82 {strides = array<i32>} : memref<1x4x128xf32, #tpu.memory_space<vmem>>, vector<1x4x128xf32>,
    return
  }
  func.func @transform_0(%arg0: i32) -> (i32, i32, i32) {
    %c0_i32 = arith.constant 0 : i32
    %c0_i32_0 = arith.constant 0 : i32
    %c0_i32_1 = arith.constant 0 : i32
    return %arg0, %c0_i32, %c0_i32_0 : i32, i32, i32
  }
  func.func @transform_1(%arg0: i32) -> (i32, i32, i32) {
    %c0_i32 = arith.constant 0 : i32
    %c0_i32_0 = arith.constant 0 : i32
    %c0_i32_1 = arith.constant 0 : i32
    %c0_i32_2 = arith.constant 0 : i32
    return %c0_i32, %c0_i32_0, %c0_i32_1 : i32, i32, i32
  }
  func.func @transform_2(%arg0: i32) -> (i32, i32) {
    %c0_i32 = arith.constant 0 : i32
    %c0_i32_0 = arith.constant 0 : i32
    %c0_i32_1 = arith.constant 0 : i32
    return %c0_i32, %c0_i32_0 : i32, i32
  }
  func.func @transform_3(%arg0: i32) -> (i32, i32) {
    %c0_i32 = arith.constant 0 : i32
    %c0_i32_0 = arith.constant 0 : i32
    %c0_i32_1 = arith.constant 0 : i32
    return %c0_i32, %c0_i32_0 : i32, i32
  }
  func.func @transform_4(%arg0: i32) -> (i32, i32, i32) {
    %c0_i32 = arith.constant 0 : i32
    %c0_i32_0 = arith.constant 0 : i32
    %c0_i32_1 = arith.constant 0 : i32
    %c0_i32_2 = arith.constant 0 : i32
    return %c0_i32, %c0_i32_0, %c0_i32_1 : i32, i32, i32
  }
  func.func @transform_5(%arg0: i32) -> (i32, i32) {
    %c0_i32 = arith.constant 0 : i32
    %c0_i32_0 = arith.constant 0 : i32
    %c0_i32_1 = arith.constant 0 : i32
    return %c0_i32, %c0_i32_0 : i32, i32
  }
  func.func @transform_6(%arg0: i32) -> (i32, i32) {
    %c0_i32 = arith.constant 0 : i32
    %c0_i32_0 = arith.constant 0 : i32
    %c0_i32_1 = arith.constant 0 : i32
    return %c0_i32, %c0_i32_0 : i32, i32
  }
  func.func @transform_7(%arg0: i32) -> (i32, i32, i32) {
    %c0_i32 = arith.constant 0 : i32
    %c0_i32_0 = arith.constant 0 : i32
    %c0_i32_1 = arith.constant 0 : i32
    return %arg0, %c0_i32, %c0_i32_0 : i32, i32, i32
  }
}

module attributes {stable_mosaic.version = 11 : i64} {
  func.func @_resblock_pass_kernel(%arg0: i32, %arg1: memref<1x4x128xf32, #tpu.memory_space<vmem>>, %arg2: memref<3x4x4xbf16, #tpu.memory_space<vmem>>, %arg3: memref<4x1xf32, #tpu.memory_space<vmem>>, %arg4: memref<4x1xf32, #tpu.memory_space<vmem>>, %arg5: memref<3x4x4xbf16, #tpu.memory_space<vmem>>, %arg6: memref<1x4x1xf32, #tpu.memory_space<vmem>>, %arg7: memref<1x4x1xf32, #tpu.memory_space<vmem>>) attributes {dimension_semantics = [#tpu.dimension_semantics<parallel>], iteration_bounds = array<i64: 2>, scalar_prefetch = 0 : i64, scratch_operands = 0 : i64, tpu.core_type = #tpu.core_type<tc>, window_params = [{transform_indices = @transform_0, window_bounds = array<i64: 1, 4, 128>}, {pipeline_mode = #tpu.pipeline_mode<synchronous>, transform_indices = @transform_1, window_bounds = array<i64: 3, 4, 4>}, {pipeline_mode = #tpu.pipeline_mode<synchronous>, transform_indices = @transform_2, window_bounds = array<i64: 4, 1>}, {pipeline_mode = #tpu.pipeline_mode<synchronous>, transform_indices = @transform_3, window_bounds = array<i64: 4, 1>}, {pipeline_mode = #tpu.pipeline_mode<synchronous>, transform_indices = @transform_4, window_bounds = array<i64: 3, 4, 4>}, {transform_indices = @transform_5, window_bounds = array<i64: 1, 4, 1>}, {transform_indices = @transform_6, window_bounds = array<i64: 1, 4, 1>}]} {
    %c0 = arith.constant 0 : index
    %c0_0 = arith.constant 0 : index
    %c0_1 = arith.constant 0 : index
    %0 = vector.load %arg1[%c0, %c0_0, %c0_1] : memref<1x4x128xf32, #tpu.memory_space<vmem>>, vector<1x4x128xf32>
    %1 = vector.shape_cast %0 : vector<1x4x128xf32> to vector<4x128xf32>
    %2 = tpu.iota {dimensions = array<i32: 1>} : vector<1x128xi32>
    %c0_i32 = arith.constant 0 : i32
    %3 = vector.broadcast %c0_i32 : i32 to vector<1x128xi32>
    %4 = arith.cmpi eq, %2, %3 : vector<1x128xi32>
    %c1_i32 = arith.constant 1 : i32
    %5 = tpu.dynamic_rotate %1 by %c1_i32 dim 1 : vector<4x128xf32>, i32 -> vector<4x128xf32>
    %cst = arith.constant 0.000000e+00 : f32
    %6 = vector.shape_cast %4 : vector<1x128xi1> to vector<1x128xi1>
    %7 = vector.broadcast %6 : vector<1x128xi1> to vector<4x128xi1>
    %8 = vector.broadcast %cst : f32 to vector<4x128xf32>
    %9 = arith.select %7, %8, %5 : vector<4x128xi1>, vector<4x128xf32>
    %c127_i32 = arith.constant 127 : i32
    %10 = vector.broadcast %c127_i32 : i32 to vector<1x128xi32>
    %11 = arith.cmpi eq, %2, %10 : vector<1x128xi32>
    %c127_i32_2 = arith.constant 127 : i32
    %12 = tpu.dynamic_rotate %1 by %c127_i32_2 dim 1 : vector<4x128xf32>, i32 -> vector<4x128xf32>
    %cst_3 = arith.constant 0.000000e+00 : f32
    %13 = vector.shape_cast %11 : vector<1x128xi1> to vector<1x128xi1>
    %14 = vector.broadcast %13 : vector<1x128xi1> to vector<4x128xi1>
    %15 = vector.broadcast %cst_3 : f32 to vector<4x128xf32>
    %16 = arith.select %14, %15, %12 : vector<4x128xi1>, vector<4x128xf32>
    %c1 = arith.constant 1 : index
    %c0_4 = arith.constant 0 : index
    %c0_5 = arith.constant 0 : index
    %17 = vector.load %arg2[%c1, %c0_4, %c0_5] : memref<3x4x4xbf16, #tpu.memory_space<vmem>>, vector<1x4x4xbf16>
    %18 = vector.shape_cast %17 : vector<1x4x4xbf16> to vector<4x4xbf16>
    %19 = arith.truncf %1 : vector<4x128xf32> to vector<4x128xbf16>
    %cst_6 = arith.constant dense<0.000000e+00> : vector<4x128xf32>
    %20 = tpu.matmul %18, %19, %cst_6 {dimension_numbers = #tpu.dot_dimension_numbers<[1], [0], [0], [1], [0, 0, 1, 1], [], []>} : vector<4x4xbf16>, vector<4x128xbf16>, vector<4x128xf32> -> vector<4x128xf32>
    %c0_7 = arith.constant 0 : index
    %c0_8 = arith.constant 0 : index
    %c0_9 = arith.constant 0 : index
    %21 = vector.load %arg2[%c0_7, %c0_8, %c0_9] : memref<3x4x4xbf16, #tpu.memory_space<vmem>>, vector<1x4x4xbf16>
    %22 = vector.shape_cast %21 : vector<1x4x4xbf16> to vector<4x4xbf16>
    %23 = arith.truncf %9 : vector<4x128xf32> to vector<4x128xbf16>
    %cst_10 = arith.constant dense<0.000000e+00> : vector<4x128xf32>
    %24 = tpu.matmul %22, %23, %cst_10 {dimension_numbers = #tpu.dot_dimension_numbers<[1], [0], [0], [1], [0, 0, 1, 1], [], []>} : vector<4x4xbf16>, vector<4x128xbf16>, vector<4x128xf32> -> vector<4x128xf32>
    %25 = arith.addf %20, %24 : vector<4x128xf32>
    %c2 = arith.constant 2 : index
    %c0_11 = arith.constant 0 : index
    %c0_12 = arith.constant 0 : index
    %26 = vector.load %arg2[%c2, %c0_11, %c0_12] : memref<3x4x4xbf16, #tpu.memory_space<vmem>>, vector<1x4x4xbf16>
    %27 = vector.shape_cast %26 : vector<1x4x4xbf16> to vector<4x4xbf16>
    %28 = arith.truncf %16 : vector<4x128xf32> to vector<4x128xbf16>
    %cst_13 = arith.constant dense<0.000000e+00> : vector<4x128xf32>
    %29 = tpu.matmul %27, %28, %cst_13 {dimension_numbers = #tpu.dot_dimension_numbers<[1], [0], [0], [1], [0, 0, 1, 1], [], []>} : vector<4x4xbf16>, vector<4x128xbf16>, vector<4x128xf32> -> vector<4x128xf32>
    %30 = arith.addf %25, %29 : vector<4x128xf32>
    %c0_14 = arith.constant 0 : index
    %c0_15 = arith.constant 0 : index
    %31 = vector.load %arg3[%c0_14, %c0_15] : memref<4x1xf32, #tpu.memory_space<vmem>>, vector<4x1xf32>
    %c0_16 = arith.constant 0 : index
    %c0_17 = arith.constant 0 : index
    %32 = vector.load %arg4[%c0_16, %c0_17] : memref<4x1xf32, #tpu.memory_space<vmem>>, vector<4x1xf32>
    %33 = vector.broadcast %31 : vector<4x1xf32> to vector<4x128xf32>
    %34 = arith.mulf %30, %33 : vector<4x128xf32>
    %35 = vector.broadcast %32 : vector<4x1xf32> to vector<4x128xf32>
    %36 = arith.addf %34, %35 : vector<4x128xf32>
    %cst_18 = arith.constant 0.000000e+00 : f32
    %37 = vector.broadcast %cst_18 : f32 to vector<4x128xf32>
    %38 = arith.maximumf %36, %37 : vector<4x128xf32>
    %c16_i32 = arith.constant 16 : i32
    %39 = vector.broadcast %c16_i32 : i32 to vector<1x128xi32>
    %40 = arith.cmpi slt, %2, %39 : vector<1x128xi32>
    %cst_19 = arith.constant 0.000000e+00 : f32
    %41 = vector.shape_cast %40 : vector<1x128xi1> to vector<1x128xi1>
    %42 = vector.broadcast %41 : vector<1x128xi1> to vector<4x128xi1>
    %43 = vector.broadcast %cst_19 : f32 to vector<4x128xf32>
    %44 = arith.select %42, %38, %43 : vector<4x128xi1>, vector<4x128xf32>
    %c0_i32_20 = arith.constant 0 : i32
    %45 = vector.broadcast %c0_i32_20 : i32 to vector<1x128xi32>
    %46 = arith.cmpi eq, %2, %45 : vector<1x128xi32>
    %c1_i32_21 = arith.constant 1 : i32
    %47 = tpu.dynamic_rotate %44 by %c1_i32_21 dim 1 : vector<4x128xf32>, i32 -> vector<4x128xf32>
    %cst_22 = arith.constant 0.000000e+00 : f32
    %48 = vector.shape_cast %46 : vector<1x128xi1> to vector<1x128xi1>
    %49 = vector.broadcast %48 : vector<1x128xi1> to vector<4x128xi1>
    %50 = vector.broadcast %cst_22 : f32 to vector<4x128xf32>
    %51 = arith.select %49, %50, %47 : vector<4x128xi1>, vector<4x128xf32>
    %c127_i32_23 = arith.constant 127 : i32
    %52 = vector.broadcast %c127_i32_23 : i32 to vector<1x128xi32>
    %53 = arith.cmpi eq, %2, %52 : vector<1x128xi32>
    %c127_i32_24 = arith.constant 127 : i32
    %54 = tpu.dynamic_rotate %44 by %c127_i32_24 dim 1 : vector<4x128xf32>, i32 -> vector<4x128xf32>
    %cst_25 = arith.constant 0.000000e+00 : f32
    %55 = vector.shape_cast %53 : vector<1x128xi1> to vector<1x128xi1>
    %56 = vector.broadcast %55 : vector<1x128xi1> to vector<4x128xi1>
    %57 = vector.broadcast %cst_25 : f32 to vector<4x128xf32>
    %58 = arith.select %56, %57, %54 : vector<4x128xi1>, vector<4x128xf32>
    %c1_26 = arith.constant 1 : index
    %c0_27 = arith.constant 0 : index
    %c0_28 = arith.constant 0 : index
    %59 = vector.load %arg5[%c1_26, %c0_27, %c0_28] : memref<3x4x4xbf16, #tpu.memory_space<vmem>>, vector<1x4x4xbf16>
    %60 = vector.shape_cast %59 : vector<1x4x4xbf16> to vector<4x4xbf16>
    %61 = arith.truncf %44 : vector<4x128xf32> to vector<4x128xbf16>
    %cst_29 = arith.constant dense<0.000000e+00> : vector<4x128xf32>
    %62 = tpu.matmul %60, %61, %cst_29 {dimension_numbers = #tpu.dot_dimension_numbers<[1], [0], [0], [1], [0, 0, 1, 1], [], []>} : vector<4x4xbf16>, vector<4x128xbf16>, vector<4x128xf32> -> vector<4x128xf32>
    %c0_30 = arith.constant 0 : index
    %c0_31 = arith.constant 0 : index
    %c0_32 = arith.constant 0 : index
    %63 = vector.load %arg5[%c0_30, %c0_31, %c0_32] : memref<3x4x4xbf16, #tpu.memory_space<vmem>>, vector<1x4x4xbf16>
    %64 = vector.shape_cast %63 : vector<1x4x4xbf16> to vector<4x4xbf16>
    %65 = arith.truncf %51 : vector<4x128xf32> to vector<4x128xbf16>
    %cst_33 = arith.constant dense<0.000000e+00> : vector<4x128xf32>
    %66 = tpu.matmul %64, %65, %cst_33 {dimension_numbers = #tpu.dot_dimension_numbers<[1], [0], [0], [1], [0, 0, 1, 1], [], []>} : vector<4x4xbf16>, vector<4x128xbf16>, vector<4x128xf32> -> vector<4x128xf32>
    %67 = arith.addf %62, %66 : vector<4x128xf32>
    %c2_34 = arith.constant 2 : index
    %c0_35 = arith.constant 0 : index
    %c0_36 = arith.constant 0 : index
    %68 = vector.load %arg5[%c2_34, %c0_35, %c0_36] : memref<3x4x4xbf16, #tpu.memory_space<vmem>>, vector<1x4x4xbf16>
    %69 = vector.shape_cast %68 : vector<1x4x4xbf16> to vector<4x4xbf16>
    %70 = arith.truncf %58 : vector<4x128xf32> to vector<4x128xbf16>
    %cst_37 = arith.constant dense<0.000000e+00> : vector<4x128xf32>
    %71 = tpu.matmul %69, %70, %cst_37 {dimension_numbers = #tpu.dot_dimension_numbers<[1], [0], [0], [1], [0, 0, 1, 1], [], []>} : vector<4x4xbf16>, vector<4x128xbf16>, vector<4x128xf32> -> vector<4x128xf32>
    %72 = arith.addf %67, %71 : vector<4x128xf32>
    %c16_i32_38 = arith.constant 16 : i32
    %73 = vector.broadcast %c16_i32_38 : i32 to vector<1x128xi32>
    %74 = arith.cmpi slt, %2, %73 : vector<1x128xi32>
    %cst_39 = arith.constant 0.000000e+00 : f32
    %75 = vector.shape_cast %74 : vector<1x128xi1> to vector<1x128xi1>
    %76 = vector.broadcast %75 : vector<1x128xi1> to vector<4x128xi1>
    %77 = vector.broadcast %cst_39 : f32 to vector<4x128xf32>
    %78 = arith.select %76, %72, %77 : vector<4x128xi1>, vector<4x128xf32>
    %cst_40 = arith.constant dense<0.000000e+00> : vector<4xf32>
    %79 = vector.multi_reduction <add>, %78, %cst_40 [1] : vector<4x128xf32> to vector<4xf32>
    %80 = vector.shape_cast %79 : vector<4xf32> to vector<4x1xf32>
    %cst_41 = arith.constant 6.250000e-02 : f32
    %81 = vector.broadcast %cst_41 : f32 to vector<4x1xf32>
    %82 = arith.mulf %80, %81 : vector<4x1xf32>
    %83 = vector.broadcast %82 : vector<4x1xf32> to vector<4x128xf32>
    %84 = arith.subf %72, %83 : vector<4x128xf32>
    %c16_i32_42 = arith.constant 16 : i32
    %85 = vector.broadcast %c16_i32_42 : i32 to vector<1x128xi32>
    %86 = arith.cmpi slt, %2, %85 : vector<1x128xi32>
    %cst_43 = arith.constant 0.000000e+00 : f32
    %87 = vector.shape_cast %86 : vector<1x128xi1> to vector<1x128xi1>
    %88 = vector.broadcast %87 : vector<1x128xi1> to vector<4x128xi1>
    %89 = vector.broadcast %cst_43 : f32 to vector<4x128xf32>
    %90 = arith.select %88, %84, %89 : vector<4x128xi1>, vector<4x128xf32>
    %91 = arith.mulf %90, %90 : vector<4x128xf32>
    %cst_44 = arith.constant dense<0.000000e+00> : vector<4xf32>
    %92 = vector.multi_reduction <add>, %91, %cst_44 [1] : vector<4x128xf32> to vector<4xf32>
    %93 = vector.shape_cast %92 : vector<4xf32> to vector<4x1xf32>
    %c0_45 = arith.constant 0 : index
    %c0_46 = arith.constant 0 : index
    %c0_47 = arith.constant 0 : index
    %94 = vector.load %arg6[%c0_45, %c0_46, %c0_47] : memref<1x4x1xf32, #tpu.memory_space<vmem>>, vector<1x4x1xf32>
    %95 = vector.shape_cast %94 : vector<1x4x1xf32> to vector<4x1xf32>
    %96 = vector.shape_cast %82 : vector<4x1xf32> to vector<1x4x1xf32>
    tpu.vector_store %arg6[%c0_45, %c0_46, %c0_47], %96 {strides = array<i32>} : memref<1x4x1xf32, #tpu.memory_space<vmem>>, vector<1x4x1xf32>,
    %c0_48 = arith.constant 0 : index
    %c0_49 = arith.constant 0 : index
    %c0_50 = arith.constant 0 : index
    %97 = vector.load %arg7[%c0_48, %c0_49, %c0_50] : memref<1x4x1xf32, #tpu.memory_space<vmem>>, vector<1x4x1xf32>
    %98 = vector.shape_cast %97 : vector<1x4x1xf32> to vector<4x1xf32>
    %99 = vector.shape_cast %93 : vector<4x1xf32> to vector<1x4x1xf32>
    tpu.vector_store %arg7[%c0_48, %c0_49, %c0_50], %99 {strides = array<i32>} : memref<1x4x1xf32, #tpu.memory_space<vmem>>, vector<1x4x1xf32>,
    return
  }
  func.func @transform_0(%arg0: i32) -> (i32, i32, i32) {
    %c0_i32 = arith.constant 0 : i32
    %c0_i32_0 = arith.constant 0 : i32
    %c0_i32_1 = arith.constant 0 : i32
    return %arg0, %c0_i32, %c0_i32_0 : i32, i32, i32
  }
  func.func @transform_1(%arg0: i32) -> (i32, i32, i32) {
    %c0_i32 = arith.constant 0 : i32
    %c0_i32_0 = arith.constant 0 : i32
    %c0_i32_1 = arith.constant 0 : i32
    %c0_i32_2 = arith.constant 0 : i32
    return %c0_i32, %c0_i32_0, %c0_i32_1 : i32, i32, i32
  }
  func.func @transform_2(%arg0: i32) -> (i32, i32) {
    %c0_i32 = arith.constant 0 : i32
    %c0_i32_0 = arith.constant 0 : i32
    %c0_i32_1 = arith.constant 0 : i32
    return %c0_i32, %c0_i32_0 : i32, i32
  }
  func.func @transform_3(%arg0: i32) -> (i32, i32) {
    %c0_i32 = arith.constant 0 : i32
    %c0_i32_0 = arith.constant 0 : i32
    %c0_i32_1 = arith.constant 0 : i32
    return %c0_i32, %c0_i32_0 : i32, i32
  }
  func.func @transform_4(%arg0: i32) -> (i32, i32, i32) {
    %c0_i32 = arith.constant 0 : i32
    %c0_i32_0 = arith.constant 0 : i32
    %c0_i32_1 = arith.constant 0 : i32
    %c0_i32_2 = arith.constant 0 : i32
    return %c0_i32, %c0_i32_0, %c0_i32_1 : i32, i32, i32
  }
  func.func @transform_5(%arg0: i32) -> (i32, i32, i32) {
    %c0_i32 = arith.constant 0 : i32
    %c0_i32_0 = arith.constant 0 : i32
    %c0_i32_1 = arith.constant 0 : i32
    return %arg0, %c0_i32, %c0_i32_0 : i32, i32, i32
  }
  func.func @transform_6(%arg0: i32) -> (i32, i32, i32) {
    %c0_i32 = arith.constant 0 : i32
    %c0_i32_0 = arith.constant 0 : i32
    %c0_i32_1 = arith.constant 0 : i32
    return %arg0, %c0_i32, %c0_i32_0 : i32, i32, i32
  }
}

</mosaic_0001>

<bundles_post_ra>
// kernel: residual_block_1d.3
= control target key start
LH: loop header
LB: loop body
LE: loop exit
PB: predicated region body
PF: predicated region fallthrough
CT: control target
= control target key end

     0   :  { %s527_s12 = smov 0   ;;  %s570_s0 = inlined_call_operand.vmem [shape: f32[2,4,128], index: 0, kind: input, shape index: {}]   ;;  %s571_s1 = inlined_call_operand.vmem [shape: bf16[3,4,4], index: 1, kind: input, shape index: {}]   ;;  %s572_s2 = inlined_call_operand.vmem [shape: f32[2,4,1], index: 2, kind: output, shape index: {0}]   ;;  %s573_s3 = inlined_call_operand.vmem [shape: f32[2,4,1], index: 3, kind: output, shape index: {1}]  }
   0x1 LB: > { %s444_s13 = sadd.s32 4294967295, %s501_s12   ;;  %p448_p0 = scmp.ge.s32.totalorder %s501_s12, 1  ;;  %s501_s12 = sphi %s527_s12, %s14_s12  }
   0x2   : > { %p139_p1 = scmp.lt.s32.totalorder %s501_s12, 3 }
   0x4   : > { %p140_p2 = pnand %p448_p0, %p139_p1 }
   0x5   : > { %p165_p3 = scmp.lt.s32.totalorder (!%p140_p2), %s444_s13, 1  ;;  %s505_s18 = smov (!%p140_p2), 1  }
   0x6   : > { %143 = sbr.rel (%p140_p2) target bundleno = 627 (0x273), region = 28  ;;  %s506_s21 = smov (!%p140_p2), 127  }
   0xb   : > { %v503_v0 = vmov 0.0   ;;  %s575_s13 = smov (!%p165_p3, %s444_s13), 1  ;;  %vm504_vm0 = vmmov 0   ;;  %vm202_vm1 = vcmask 1041408   ;;  %vm198_vm2 = vcmask 31744  }
   0xc   : > { %465 = vmatprep.subr.bf16.mxu0 %v503_v0  ;;  %471 = vmatprep.subr.bf16.mxu1 %v503_v0  ;;  %s537_s14 = sshll.u32 %s575_s13, 2  ;;  %v452_v4 = vld [vmem:[%s571_s1 + $0x2] sm:$0x3]  ;;  %v179_v5 = vlaneseq  ;;  %v196_v13 = vld [vmem:[%s571_s1] sm:$0x3]  ;;  %vm346_vm6 = vcmask 1043456  }
   0xd   : > { %467 = vmatprep.mubr.msk.bf16.mxu0 %vm504_vm0, %v503_v0  ;;  %473 = vmatprep.mubr.msk.bf16.mxu1 %vm504_vm0, %v503_v0  ;;  %s168_s17 = scalar_lea.vmem %s570_s0, %s537_s14  ;;  %v455_v16 = vld [vmem:[%s571_s1 + $0x4] sm:$0x3]  ;;  %s172_s28 = scalar_lea.vmem %s572_s2, %s537_s14  ;;  %vm357_vm7 = vcmask 3072  }
   0xe   : > { %v178_v1 = vld [vmem:[%s168_s17] sm:$0xf]  ;;  %v180_v6 = vand.u32 127, %v179_v5  ;;  %s176_s4 = scalar_lea.vmem %s573_s3, %s537_s14 }
   0xf   : > { %182 = vrot.lane.b32.xlu0 %v178_v1, %s505_s18  ;;  %v195_v2 = vpack.c.bf16 %v178_v1, %v178_v1 }
  0x10   : > { %vm181_vm3 = vcmp.eq.s32.totalorder %v180_v6, 0  ;;  %vm187_vm4 = vcmp.eq.s32.totalorder %v180_v6, 127  ;;  %vm342_vm5 = vcmp.lt.s32.totalorder %v180_v6, 16 }
  0x11   : > { %v250_v3 = vsel %vm202_vm1, %v195_v2, 0 }
  0x12   : > { %472 = vmatpush3.bf16.msra.mxu1 %v250_v3 }
  0x13   : > { %188 = vrot.lane.b32.xlu0 %v178_v1, %s506_s21 }
  0x15   : > { %474 = vmatmul.mubr.msk.bf16.vlgmr.msra.gmra.mxu1 %vm198_vm2, %v452_v4 }
  0x81   : > { %v183_v7 = vpop.permute.xlu0 %182 }
  0x82   : > { %v186_v8 = vsel %vm181_vm3, 0.0, %v183_v7 }
  0x83   : > { %v197_v9 = vpack.c.bf16 %v186_v8, %v186_v8 }
  0x85   : > { %v189_v10 = vpop.permute.xlu0 %188  ;;  %v204_v11 = vsel %vm202_vm1, %v197_v9, 0 }
  0x86   : > { %v192_v12 = vsel %vm187_vm4, 0.0, %v189_v10  ;;  %466 = vmatpush3.bf16.msra.mxu0 %v204_v11 }
  0x87   : > { %v294_v14 = vpack.c.bf16 %v192_v12, %v192_v12  ;;  %477 = vmatprep.subr.bf16.mxu0 %v503_v0 }
  0x89   : > { %v299_v15 = vsel %vm202_vm1, %v294_v14, 0  ;;  %468 = vmatmul.mubr.msk.bf16.vlgmr.msra.gmra.mxu0 %vm198_vm2, %v196_v13 }
  0x8a   : > { %478 = vmatpush3.bf16.msra.mxu0 %v299_v15  ;;  %479 = vmatprep.mubr.msk.bf16.mxu0 %vm504_vm0, %v503_v0 }
  0x91   : > { %480 = vmatmul.mubr.msk.bf16.vlgmr.msra.gmra.mxu0 %vm198_vm2, %v455_v16 }
  0xd5   : > { %v286_v17 = vpop.f32.mrf.mxu1 }
  0xd7   : > { %v475_v18 = vpop.f32.mrf.mxu1 }
  0xd9   : > { %v289_v19 = vpop.f32.mrf.mxu1 }
  0xdb   : > { %v476_v20 = vpop.f32.mrf.mxu1 }
 0x149   : > { %v240_v21 = vpop.f32.mrf.mxu0 }
 0x14a   : > { %v287_v25 = vadd.f32 %v286_v17, %v240_v21 }
 0x14b   : > { %v469_v22 = vpop.f32.mrf.mxu0 }
 0x14d   : > { %v243_v23 = vpop.f32.mrf.mxu0 }
 0x14f   : > { %v470_v24 = vpop.f32.mrf.mxu0 }
 0x151   : > { %v335_v26 = vpop.f32.mrf.mxu0 }
 0x152   : > { %v341_v27 = vadd.f32 %v335_v26, %v287_v25 }
 0x153   : > { %v481_v28 = vpop.f32.mrf.mxu0 }
 0x154   : > { %v345_v29 = vsel %vm342_vm5, %v341_v27, 0.0 }
 0x155   : > { %v338_v30 = vpop.f32.mrf.mxu0  ;;  %v347_v31 = vsel %vm346_vm6, %v345_v29, 0.0 }
 0x156   : > { %348 = vadd.xlane.f32.xlu1 %v347_v31 }
 0x157   : > { %v482_v32 = vpop.f32.mrf.mxu0 }
 0x1df   : > { %v349_v33 = vpop.xlane.xlu1 %348 }
 0x1e0   : > { %v350_v34 = vmul.f32 0.0625, %v349_v33 }
 0x1e2   : > { %v351_v35 = vsub.f32 %v341_v27, %v350_v34  ;;  %358 = vst.msk [vmem:[%s172_s28] sm:$0xf] %vm357_vm7, %v350_v34 }
 0x1e4   : > { %v352_v36 = vsel %vm342_vm5, %v351_v35, 0.0 }
 0x1e5   : > { %v353_v37 = vmul.f32 %v352_v36, %v352_v36 }
 0x1e7   : > { %v354_v38 = vsel %vm346_vm6, %v353_v37, 0.0 }
 0x1e8   : > { %355 = vadd.xlane.f32.xlu1 %v354_v38 }
 0x271   : > { %v356_v39 = vpop.xlane.xlu1 %355 }
 0x272   : > { %359 = vst.msk [vmem:[%s176_s4] sm:$0xf] %vm357_vm7, %v356_v39 }
 0x273 PF: > { %s14_s12 = sadd.s32 1, %s501_s12  }
 0x274   : > { %p11_p4 = scmp.ge.s32.totalorder %s14_s12, 4  }
 0x276   :  { %13 = sbr.rel (!%p11_p4) target bundleno = 1 (0x1), region = 72 }

// kernel: residual_block_1d.5
= control target key start
LH: loop header
LB: loop body
LE: loop exit
PB: predicated region body
PF: predicated region fallthrough
CT: control target
= control target key end

     0   :  { %12 = vsyncpa [#allocation3], 0  ;;  %s1084_s0 = inlined_call_operand.vmem [shape: f32[2,4,128], index: 0, kind: input, shape index: {}]   ;;  %s1085_s1 = inlined_call_operand.vmem [shape: bf16[3,4,4], index: 1, kind: input, shape index: {}]   ;;  %s1086_s2 = inlined_call_operand.vmem [shape: f32[4,1], index: 2, kind: input, shape index: {}]   ;;  %s1087_s3 = inlined_call_operand.vmem [shape: f32[4,1], index: 3, kind: input, shape index: {}]   ;;  %s1088_s4 = inlined_call_operand.vmem [shape: bf16[3,4,4], index: 4, kind: input, shape index: {}]   ;;  %s1089_s5 = inlined_call_operand.vmem [shape: f32[4,1], index: 5, kind: input, shape index: {}]   ;;  %s1090_s6 = inlined_call_operand.vmem [shape: f32[4,1], index: 6, kind: input, shape index: {}]   ;;  %s1091_s7 = inlined_call_operand.hbm [shape: f32[2,4,128], index: 7, kind: output, shape index: {}]  }
   0x1   :  { %14 = vsyncpa [#allocation3 + $0x1], 0  ;;  %s922_s24 = smov 0   ;;  %s924_s25 = smov 0  }
   0x2   :  { %s926_s26 = smov 0   ;;  %s928_s27 = smov 0  }
   0x3 LB: > { %s943_s28 = sadd.s32 4294967295, %s874_s27   ;;  %s700_s29 = sadd.s32 4294967294, %s874_s27   ;;  %s874_s27 = sphi %s928_s27, %s1097_s27   ;;  %s870_s26 = sphi %s926_s26, %s1096_s26   ;;  %s866_s25 = sphi %s924_s25, %s1095_s25   ;;  %s862_s24 = sphi %s922_s24, %s1094_s24  }
   0x4   : > { %s947_s30 = sadd.s32 1, %s874_s27   ;;  %s179_s8 = sadd.s32 1, %s870_s26 }
   0x5   : > { %s176_s9 = ssub.s32 %s874_s27, %s947_s30  ;;  %p189_p0 = scmp.ne.s32.totalorder %s870_s26, %s866_s25 }
   0x6   : > { %p177_p1 = scmp.eq.s32.totalorder %s176_s9, 0  ;;  %p190_p2 = scmp.eq.s32.totalorder %s943_s28, 1 }
   0x7   : > { %p195_p3 = scmp.ne.s32.totalorder %s866_s25, %s862_s24  ;;  %p196_p4 = scmp.eq.s32.totalorder %s700_s29, 1 }
   0x8   : > { %s958_s10 = scalar_select %p177_p1, %s870_s26, %s179_s8  }
   0x9   : > { %p960_p5 = por %p190_p2, %p189_p0  ;;  %p964_p6 = por %p196_p4, %p195_p3 }
   0xa   : > { %p703_p7 = scmp.ge.s32.totalorder %s874_s27, 1  ;;  %p239_p8 = scmp.lt.s32.totalorder %s874_s27, 3 }
   0xc   : > { %p240_p9 = pnand %p703_p7, %p239_p8 }
   0xd   : > { %p270_p10 = scmp.lt.s32.totalorder (!%p240_p9), %s943_s28, 1  ;;  %s878_s18 = smov (!%p240_p9), 1  }
   0xe   : > { %243 = sbr.rel (%p240_p9) target bundleno = 700 (0x2bc), region = 48  ;;  %s880_s23 = smov (!%p240_p9), 127  }
   0xf   : > { %s267_s9 = sand.u32 (!%p240_p9), 1, %s866_s25  }
  0x10   : > { %s628_s21 = scalar_lea.sflag (!%p240_p9), [#allocation3], %s267_s9 }
  0x13   : > { %v876_v0 = vmov 0.0   ;;  %s271_s13 = scalar_select %p270_p10, %s943_s28, 1  ;;  %vm877_vm0 = vmmov 0   ;;  %vm299_vm1 = vcmask 1041408   ;;  %v439_v4 = vld [vmem:[%s1086_s2] sm:$0xf]  ;;  %v276_v8 = vlaneseq }
  0x14   : > { %732 = vmatprep.subr.bf16.mxu0 %v876_v0  ;;  %738 = vmatprep.subr.bf16.mxu1 %v876_v0  ;;  %vm295_vm2 = vcmask 31744   ;;  %v706_v5 = vld [vmem:[%s1085_s1 + $0x2] sm:$0x3]  ;;  %v879_v6 = vmov 0   ;;  %v293_v15 = vld [vmem:[%s1085_s1] sm:$0x3] }
  0x15   : > { %734 = vmatprep.mubr.msk.bf16.mxu0 %vm877_vm0, %v876_v0  ;;  %740 = vmatprep.mubr.msk.bf16.mxu1 %vm877_vm0, %v876_v0  ;;  %s705_s14 = sshll.u32 %s271_s13, 2  ;;  %v440_v7 = vld [vmem:[%s1087_s3] sm:$0xf]  ;;  %v277_v9 = vand.u32 127, %v276_v8  ;;  %v709_v19 = vld [vmem:[%s1085_s1 + $0x4] sm:$0x3] }
  0x16   : > { %s273_s17 = scalar_lea.vmem %s1084_s0, %s705_s14  ;;  %812 = vset.pattern.permute.xlu1 %v879_v6  ;;  %813 = vset.pattern.permute.xlu0 %v879_v6  ;;  %v612_v41 = vld [vmem:[%s1090_s6] sm:$0xf]  ;;  %v714_v54 = vld [vmem:[%s1088_s4 + $0x4] sm:$0x3]  ;;  %s704_s13 = sshll.u32 %s267_s9, 2 }
  0x17   : > { %v981_v1 = vld [vmem:[%s273_s17] sm:$0xf]  ;;  %443 = vperm.xlu1 %812, %v439_v4   ;;  %vm278_vm3 = vcmp.eq.s32.totalorder %v277_v9, 0  ;;  %vm284_vm4 = vcmp.eq.s32.totalorder %v277_v9, 127  ;;  %vm454_vm5 = vcmp.lt.s32.totalorder %v277_v9, 16  ;;  %s717_s14 = sshll.u32 %s943_s28, 6 }
  0x18   : > { %279 = vrot.lane.b32.xlu0 %v981_v1, %s878_s18  ;;  %v292_v2 = vpack.c.bf16 %v981_v1, %v981_v1  ;;  %v611_v43 = vld [vmem:[%s1089_s5] sm:$0xf]  ;;  %s269_s15 = scalar_lea.vmem [#allocation2], %s704_s13  ;;  %s639_s20 = scalar_lea.hbm %s1091_s7, %s717_s14 }
  0x19   : > { %v711_v44 = vld [vmem:[%s1088_s4 + $0x2] sm:$0x3]  ;;  %v467_v52 = vld [vmem:[%s1088_s4] sm:$0x3]  ;;  %s641_s16 = sshll.u32 %s269_s15, 4  ;;  %s881_s28 = smov [#allocation2]   ;;  %s642_s16 = int_to_ptr.vmem [resolvable:$true] %s641_s16 }
  0x1a   : > { %v347_v3 = vsel %vm299_vm1, %v292_v2, 0  ;;  %s814_s22 = scalar_lea.vmem %s642_s16, 64 }
  0x1b   : > { %739 = vmatpush3.bf16.msra.mxu1 %v347_v3  ;;  %449 = vperm.xlu1 %812, %v440_v7   ;;  %p815_p11 = scmp.ne.s32.totalorder %s642_s16, %s814_s22 }
  0x1c   : > { %285 = vrot.lane.b32.xlu0 %v981_v1, %s880_s23  ;;  %750 = vmatprep.subr.bf16.mxu1 %v876_v0 }
  0x1d   : > { %p816_p12 = pnand %p815_p11, %p960_p5 }
  0x1e   : > { %741 = vmatmul.mubr.msk.bf16.vlgmr.msra.gmra.mxu1 %vm295_vm2, %v706_v5 }
  0x1f   : > { %752 = vmatprep.mubr.msk.bf16.mxu1 %vm877_vm0, %v876_v0  ;;  %p817_p13 = pneg %p816_p12 }
  0x8a   : > { %v280_v10 = vpop.permute.xlu0 %279 }
  0x8b   : > { %v283_v11 = vsel %vm278_vm3, 0.0, %v280_v10 }
  0x8c   : > { %v294_v12 = vpack.c.bf16 %v283_v11, %v283_v11 }
  0x8e   : > { %v301_v13 = vsel %vm299_vm1, %v294_v12, 0  ;;  %v286_v14 = vpop.permute.xlu0 %285 }
  0x8f   : > { %733 = vmatpush3.bf16.msra.mxu0 %v301_v13  ;;  %v289_v16 = vsel %vm284_vm4, 0.0, %v286_v14 }
  0x90   : > { %v391_v17 = vpack.c.bf16 %v289_v16, %v289_v16  ;;  %744 = vmatprep.subr.bf16.mxu0 %v876_v0 }
  0x92   : > { %735 = vmatmul.mubr.msk.bf16.vlgmr.msra.gmra.mxu0 %vm295_vm2, %v293_v15  ;;  %v396_v18 = vsel %vm299_vm1, %v391_v17, 0  ;;  %v444_v27 = vpop.permute.xlu1 %443 }
  0x93   : > { %745 = vmatpush3.bf16.msra.mxu0 %v396_v18  ;;  %746 = vmatprep.mubr.msk.bf16.mxu0 %vm877_vm0, %v876_v0 }
  0x94   : > { %756 = vmatprep.subr.bf16.mxu0 %v876_v0 }
  0x96   : > { %v450_v34 = vpop.permute.xlu1 %449 }
  0x9a   : > { %747 = vmatmul.mubr.msk.bf16.vlgmr.msra.gmra.mxu0 %vm295_vm2, %v709_v19 }
  0x9b   : > { %758 = vmatprep.mubr.msk.bf16.mxu0 %vm877_vm0, %v876_v0 }
  0xde   : > { %v383_v20 = vpop.f32.mrf.mxu1 }
  0xe0   : > { %v742_v21 = vpop.f32.mrf.mxu1 }
  0xe2   : > { %v386_v22 = vpop.f32.mrf.mxu1 }
  0xe4   : > { %v743_v23 = vpop.f32.mrf.mxu1 }
 0x152   : > { %v337_v24 = vpop.f32.mrf.mxu0 }
 0x153   : > { %v384_v29 = vadd.f32 %v383_v20, %v337_v24 }
 0x154   : > { %v736_v25 = vpop.f32.mrf.mxu0 }
 0x156   : > { %v340_v26 = vpop.f32.mrf.mxu0 }
 0x158   : > { %v737_v28 = vpop.f32.mrf.mxu0 }
 0x15a   : > { %v432_v30 = vpop.f32.mrf.mxu0 }
 0x15b   : > { %v438_v31 = vadd.f32 %v432_v30, %v384_v29 }
 0x15c   : > { %v748_v32 = vpop.f32.mrf.mxu0 }
 0x15d   : > { %v446_v33 = vmul.f32 %v444_v27, %v438_v31 }
 0x15e   : > { %v435_v35 = vpop.f32.mrf.mxu0 }
 0x15f   : > { %v452_v36 = vadd.f32 %v450_v34, %v446_v33 }
 0x160   : > { %v749_v37 = vpop.f32.mrf.mxu0 }
 0x161   : > { %v453_v38 = vmax.f32 %v452_v36, 0.0 }
 0x163   : > { %v457_v39 = vsel %vm454_vm5, %v453_v38, 0.0 }
 0x164   : > { %461 = vrot.lane.b32.xlu1 %v457_v39, %s880_s23  ;;  %v466_v40 = vpack.c.bf16 %v457_v39, %v457_v39  ;;  %458 = vrot.lane.b32.xlu0 %v457_v39, %s878_s18  ;;  %s818_s18 = sshll.u32 %s881_s28, 4  ;;  %s819_s18 = int_to_ptr.vmem [resolvable:$false] %s818_s18 }
 0x165   : > { %s820_s23 = scalar_lea.vmem %s819_s18, 128  ;;  %p821_p0 = scmp.lt.s32.totalorder %s642_s16, %s819_s18 }
 0x166   : > { %v519_v42 = vsel %vm299_vm1, %v466_v40, 0  ;;  %p822_p1 = scmp.lt.s32.totalorder %s820_s23, %s814_s22 }
 0x167   : > { %757 = vmatpush3.bf16.msra.mxu0 %v519_v42 }
 0x168   : > { %622 = vperm.xlu1 %812, %v612_v41   ;;  %615 = vperm.xlu0 %813, %v611_v43   ;;  %p823_p2 = por %p822_p1, %p821_p0 }
 0x16a   : > { %759 = vmatmul.mubr.msk.bf16.vlgmr.msra.gmra.mxu0 %vm295_vm2, %v711_v44  ;;  %p824_p3 = pnand %p823_p2, %p817_p13 }
 0x1d6   : > { %v462_v45 = vpop.permute.xlu1 %461  ;;  %v459_v46 = vpop.permute.xlu0 %458 }
 0x1d7   : > { %v463_v47 = vsel %vm284_vm4, 0.0, %v462_v45  ;;  %v460_v48 = vsel %vm278_vm3, 0.0, %v459_v46 }
 0x1d8   : > { %v468_v49 = vpack.c.bf16 %v460_v48, %v460_v48  ;;  %v563_v50 = vpack.c.bf16 %v463_v47, %v463_v47 }
 0x1da   : > { %v473_v51 = vsel %vm299_vm1, %v468_v49, 0  ;;  %v568_v53 = vsel %vm299_vm1, %v563_v50, 0 }
 0x1db   : > { %751 = vmatpush3.bf16.msra.mxu1 %v473_v51 }
 0x1dc   : > { %762 = vmatprep.subr.bf16.mxu1 %v876_v0 }
 0x1de   : > { %753 = vmatmul.mubr.msk.bf16.vlgmr.msra.gmra.mxu1 %vm295_vm2, %v467_v52 }
 0x1df   : > { %763 = vmatpush3.bf16.msra.mxu1 %v568_v53  ;;  %764 = vmatprep.mubr.msk.bf16.mxu1 %vm877_vm0, %v876_v0 }
 0x1e3   : > { %v616_v0 = vpop.permute.xlu0 %615  ;;  %v623_v8 = vpop.permute.xlu1 %622 }
 0x1e6   : > { %765 = vmatmul.mubr.msk.bf16.vlgmr.msra.gmra.mxu1 %vm295_vm2, %v714_v54 }
 0x22a   : > { %v555_v55 = vpop.f32.mrf.mxu0 }
 0x22c   : > { %v760_v56 = vpop.f32.mrf.mxu0 }
 0x22e   : > { %v558_v57 = vpop.f32.mrf.mxu0 }
 0x230   : > { %v761_v58 = vpop.f32.mrf.mxu0 }
 0x29e   : > { %v509_v59 = vpop.f32.mrf.mxu1 }
 0x29f   : > { %v556_v63 = vadd.f32 %v555_v55, %v509_v59 }
 0x2a0   : > { %v754_v60 = vpop.f32.mrf.mxu1 }
 0x2a2   : > { %v512_v61 = vpop.f32.mrf.mxu1 }
 0x2a4   : > { %v755_v62 = vpop.f32.mrf.mxu1 }
 0x2a6   : > { %v604_v2 = vpop.f32.mrf.mxu1 }
 0x2a7   : > { %v610_v3 = vadd.f32 %v604_v2, %v556_v63 }
 0x2a8   : > { %v766_v4 = vpop.f32.mrf.mxu1 }
 0x2a9   : > { %v618_v5 = vmul.f32 %v616_v0, %v610_v3 }
 0x2aa   : > { %v607_v6 = vpop.f32.mrf.mxu1 }
 0x2ab   : > { %v619_v7 = vadd.f32 %v618_v5, %v981_v1 }
 0x2ac   : > { %v767_v9 = vpop.f32.mrf.mxu1 }
 0x2ad   : > { %v625_v10 = vadd.f32 %v623_v8, %v619_v7 }
 0x2af   : > { %626 = vst [vmem:[%s269_s15] sm:$0xf] %v625_v10 }
 0x2b0   : > { %827 = shalt.err (!%p824_p3)
}
 0x2b1   : > { %s828_s29 = scalar_lea.hbm %s639_s20, 64  ;;  %s832_s13 = scalar_lea.hbm %s1091_s7, 128 }
 0x2b2   : > { %p829_p4 = scmp.ne.s32.totalorder %s639_s20, %s828_s29  ;;  %p833_p9 = scmp.lt.s32.totalorder %s639_s20, %s1091_s7 }
 0x2b3   : > { %p834_p10 = scmp.lt.s32.totalorder %s832_s13, %s828_s29 }
 0x2b4   : > { %p830_p7 = pnand %p829_p4, %p960_p5 }
 0x2b5   : > { %p835_p11 = por %p834_p10, %p833_p9 }
 0x2b6   : > { %p831_p8 = pneg %p830_p7 }
 0x2b8   : > { %p836_p12 = pnand %p835_p11, %p831_p8 }
 0x2ba   : > { %839 = shalt.err (!%p836_p12)
}
 0x2bb   : > { %768 = dma.vmem_to_hbm [thread:$0]  (%p960_p5), %s642_s16, 64, %s639_s20, %s628_s21  }
 0x2bc PF: > { %p774_p13 = scmp.ge.s32.totalorder %s874_s27, 2  ;;  %s653_s17 = sand.u32 1, %s862_s24  }
 0x2bd   : > { %s654_s19 = scalar_lea.sflag [#allocation3], %s653_s17 }
 0x2be   : > { %p771_p0 = pnand %p774_p13, %p964_p6 }
 0x2c0   : > { %p772_p1 = pneg %p771_p0 }
 0x2c2   : > { %857 = dma.done.wait (%p772_p1), %s654_s19, 64  }
 0x2c3   : > { %859 = vsyncadd (%p772_p1), %s654_s19, 4294967232  ;;  %p17_p2 = scmp.ge.s32.totalorder %s947_s30, 4   ;;  %s1094_s24 = smov %s866_s25 }
 0x2c4   : > { %s1095_s25 = smov %s870_s26  ;;  %s1096_s26 = smov %s958_s10 }
 0x2c5   : > { %s1097_s27 = smov %s947_s30  ;;  %19 = sbr.rel (!%p17_p2) target bundleno = 3 (0x3), region = 87 }
 0x2ca   :  { %659 = vsyncpa [#allocation3], 1 }
 0x2cb   :  { %661 = vsyncpa [#allocation3 + $0x1], 1 }

// kernel: residual_block_1d.4
= control target key start
LH: loop header
LB: loop body
LE: loop exit
PB: predicated region body
PF: predicated region fallthrough
CT: control target
= control target key end

     0   :  { %s825_s21 = smov 0   ;;  %s927_s0 = inlined_call_operand.vmem [shape: f32[2,4,128], index: 0, kind: input, shape index: {}]   ;;  %s928_s1 = inlined_call_operand.vmem [shape: bf16[3,4,4], index: 1, kind: input, shape index: {}]   ;;  %s929_s2 = inlined_call_operand.vmem [shape: f32[4,1], index: 2, kind: input, shape index: {}]   ;;  %s930_s3 = inlined_call_operand.vmem [shape: f32[4,1], index: 3, kind: input, shape index: {}]   ;;  %s931_s4 = inlined_call_operand.vmem [shape: bf16[3,4,4], index: 4, kind: input, shape index: {}]   ;;  %s932_s5 = inlined_call_operand.vmem [shape: f32[2,4,1], index: 5, kind: output, shape index: {0}]   ;;  %s933_s6 = inlined_call_operand.vmem [shape: f32[2,4,1], index: 6, kind: output, shape index: {1}]  }
   0x1 LB: > { %s694_s22 = sadd.s32 4294967295, %s783_s21   ;;  %p698_p0 = scmp.ge.s32.totalorder %s783_s21, 1  ;;  %s783_s21 = sphi %s825_s21, %s17_s21  }
   0x2   : > { %p214_p1 = scmp.lt.s32.totalorder %s783_s21, 3 }
   0x4   : > { %p215_p2 = pnand %p698_p0, %p214_p1 }
   0x5   : > { %p246_p3 = scmp.lt.s32.totalorder (!%p215_p2), %s694_s22, 1  ;;  %s787_s27 = smov (!%p215_p2), 1  }
   0x6   : > { %218 = sbr.rel (%p215_p2) target bundleno = 959 (0x3bf), region = 40  ;;  %s789_s8 = smov (!%p215_p2), 127  }
   0xb   : > { %v785_v0 = vmov 0.0   ;;  %s935_s22 = smov (!%p246_p3, %s694_s22), 1  ;;  %vm786_vm0 = vmmov 0   ;;  %vm283_vm1 = vcmask 1041408   ;;  %v423_v4 = vld [vmem:[%s929_s2] sm:$0xf]  ;;  %v260_v8 = vlaneseq }
   0xc   : > { %726 = vmatprep.subr.bf16.mxu0 %v785_v0  ;;  %732 = vmatprep.subr.bf16.mxu1 %v785_v0  ;;  %s839_s23 = sshll.u32 %s935_s22, 2  ;;  %vm279_vm2 = vcmask 31744   ;;  %v702_v5 = vld [vmem:[%s928_s1 + $0x2] sm:$0x3]  ;;  %v788_v6 = vmov 0   ;;  %vm596_vm6 = vcmask 1043456  }
   0xd   : > { %728 = vmatprep.mubr.msk.bf16.mxu0 %vm786_vm0, %v785_v0  ;;  %734 = vmatprep.mubr.msk.bf16.mxu1 %vm786_vm0, %v785_v0  ;;  %s249_s26 = scalar_lea.vmem %s927_s0, %s839_s23  ;;  %v424_v7 = vld [vmem:[%s930_s3] sm:$0xf]  ;;  %v861_v9 = vand.u32 127, %v260_v8  ;;  %v705_v19 = vld [vmem:[%s928_s1 + $0x4] sm:$0x3]  ;;  %s253_s25 = scalar_lea.vmem %s932_s5, %s839_s23  ;;  %vm607_vm7 = vcmask 3072  }
   0xe   : > { %v259_v1 = vld [vmem:[%s249_s26] sm:$0xf]  ;;  %775 = vset.pattern.permute.xlu1 %v788_v6  ;;  %776 = vset.pattern.permute.xlu0 %v788_v6  ;;  %v710_v52 = vld [vmem:[%s931_s4 + $0x4] sm:$0x3]  ;;  %s257_s28 = scalar_lea.vmem %s933_s6, %s839_s23 }
   0xf   : > { %263 = vrot.lane.b32.xlu0 %v259_v1, %s787_s27  ;;  %v276_v2 = vpack.c.bf16 %v259_v1, %v259_v1  ;;  %427 = vperm.xlu1 %775, %v423_v4   ;;  %vm262_vm3 = vcmp.eq.s32.totalorder %v861_v9, 0  ;;  %vm268_vm4 = vcmp.eq.s32.totalorder %v861_v9, 127  ;;  %v277_v15 = vld [vmem:[%s928_s1] sm:$0x3]  ;;  %vm438_vm5 = vcmp.lt.s32.totalorder %v861_v9, 16 }
  0x10   : > { %v707_v42 = vld [vmem:[%s931_s4 + $0x2] sm:$0x3]  ;;  %v451_v50 = vld [vmem:[%s931_s4] sm:$0x3] }
  0x11   : > { %v331_v3 = vsel %vm283_vm1, %v276_v2, 0 }
  0x12   : > { %733 = vmatpush3.bf16.msra.mxu1 %v331_v3 }
  0x13   : > { %269 = vrot.lane.b32.xlu0 %v259_v1, %s789_s8  ;;  %744 = vmatprep.subr.bf16.mxu1 %v785_v0 }
  0x14   : > { %433 = vperm.xlu1 %775, %v424_v7  }
  0x15   : > { %735 = vmatmul.mubr.msk.bf16.vlgmr.msra.gmra.mxu1 %vm279_vm2, %v702_v5 }
  0x16   : > { %746 = vmatprep.mubr.msk.bf16.mxu1 %vm786_vm0, %v785_v0 }
  0x81   : > { %v264_v10 = vpop.permute.xlu0 %263 }
  0x82   : > { %v267_v11 = vsel %vm262_vm3, 0.0, %v264_v10 }
  0x83   : > { %v278_v12 = vpack.c.bf16 %v267_v11, %v267_v11 }
  0x85   : > { %v285_v13 = vsel %vm283_vm1, %v278_v12, 0  ;;  %v270_v14 = vpop.permute.xlu0 %269 }
  0x86   : > { %727 = vmatpush3.bf16.msra.mxu0 %v285_v13  ;;  %v273_v16 = vsel %vm268_vm4, 0.0, %v270_v14 }
  0x87   : > { %v375_v17 = vpack.c.bf16 %v273_v16, %v273_v16  ;;  %738 = vmatprep.subr.bf16.mxu0 %v785_v0 }
  0x89   : > { %729 = vmatmul.mubr.msk.bf16.vlgmr.msra.gmra.mxu0 %vm279_vm2, %v277_v15  ;;  %v380_v18 = vsel %vm283_vm1, %v375_v17, 0 }
  0x8a   : > { %739 = vmatpush3.bf16.msra.mxu0 %v380_v18  ;;  %740 = vmatprep.mubr.msk.bf16.mxu0 %vm786_vm0, %v785_v0  ;;  %v428_v27 = vpop.permute.xlu1 %427 }
  0x8b   : > { %750 = vmatprep.subr.bf16.mxu0 %v785_v0 }
  0x8f   : > { %v434_v34 = vpop.permute.xlu1 %433 }
  0x91   : > { %741 = vmatmul.mubr.msk.bf16.vlgmr.msra.gmra.mxu0 %vm279_vm2, %v705_v19 }
  0x92   : > { %752 = vmatprep.mubr.msk.bf16.mxu0 %vm786_vm0, %v785_v0 }
  0xd5   : > { %v367_v20 = vpop.f32.mrf.mxu1 }
  0xd7   : > { %v736_v21 = vpop.f32.mrf.mxu1 }
  0xd9   : > { %v370_v22 = vpop.f32.mrf.mxu1 }
  0xdb   : > { %v737_v23 = vpop.f32.mrf.mxu1 }
 0x149   : > { %v321_v24 = vpop.f32.mrf.mxu0 }
 0x14a   : > { %v368_v29 = vadd.f32 %v367_v20, %v321_v24 }
 0x14b   : > { %v730_v25 = vpop.f32.mrf.mxu0 }
 0x14d   : > { %v324_v26 = vpop.f32.mrf.mxu0 }
 0x14f   : > { %v731_v28 = vpop.f32.mrf.mxu0 }
 0x151   : > { %v416_v30 = vpop.f32.mrf.mxu0 }
 0x152   : > { %v422_v31 = vadd.f32 %v416_v30, %v368_v29 }
 0x153   : > { %v742_v32 = vpop.f32.mrf.mxu0 }
 0x154   : > { %v430_v33 = vmul.f32 %v428_v27, %v422_v31 }
 0x155   : > { %v419_v35 = vpop.f32.mrf.mxu0 }
 0x156   : > { %v436_v36 = vadd.f32 %v434_v34, %v430_v33 }
 0x157   : > { %v743_v37 = vpop.f32.mrf.mxu0 }
 0x158   : > { %v437_v38 = vmax.f32 %v436_v36, 0.0 }
 0x15a   : > { %v441_v39 = vsel %vm438_vm5, %v437_v38, 0.0 }
 0x15b   : > { %445 = vrot.lane.b32.xlu1 %v441_v39, %s789_s8  ;;  %v450_v40 = vpack.c.bf16 %v441_v39, %v441_v39  ;;  %442 = vrot.lane.b32.xlu0 %v441_v39, %s787_s27 }
 0x15d   : > { %v503_v41 = vsel %vm283_vm1, %v450_v40, 0 }
 0x15e   : > { %751 = vmatpush3.bf16.msra.mxu0 %v503_v41 }
 0x161   : > { %753 = vmatmul.mubr.msk.bf16.vlgmr.msra.gmra.mxu0 %vm279_vm2, %v707_v42 }
 0x1cd   : > { %v446_v43 = vpop.permute.xlu1 %445  ;;  %v443_v44 = vpop.permute.xlu0 %442 }
 0x1ce   : > { %v447_v45 = vsel %vm268_vm4, 0.0, %v446_v43  ;;  %v444_v46 = vsel %vm262_vm3, 0.0, %v443_v44 }
 0x1cf   : > { %v452_v47 = vpack.c.bf16 %v444_v46, %v444_v46  ;;  %v547_v48 = vpack.c.bf16 %v447_v45, %v447_v45 }
 0x1d1   : > { %v457_v49 = vsel %vm283_vm1, %v452_v47, 0  ;;  %v552_v51 = vsel %vm283_vm1, %v547_v48, 0 }
 0x1d2   : > { %745 = vmatpush3.bf16.msra.mxu1 %v457_v49 }
 0x1d3   : > { %756 = vmatprep.subr.bf16.mxu1 %v785_v0 }
 0x1d5   : > { %747 = vmatmul.mubr.msk.bf16.vlgmr.msra.gmra.mxu1 %vm279_vm2, %v451_v50 }
 0x1d6   : > { %757 = vmatpush3.bf16.msra.mxu1 %v552_v51  ;;  %758 = vmatprep.mubr.msk.bf16.mxu1 %vm786_vm0, %v785_v0 }
 0x1dd   : > { %759 = vmatmul.mubr.msk.bf16.vlgmr.msra.gmra.mxu1 %vm279_vm2, %v710_v52 }
 0x221   : > { %v539_v53 = vpop.f32.mrf.mxu0 }
 0x223   : > { %v754_v54 = vpop.f32.mrf.mxu0 }
 0x225   : > { %v542_v55 = vpop.f32.mrf.mxu0 }
 0x227   : > { %v755_v56 = vpop.f32.mrf.mxu0 }
 0x295   : > { %v493_v57 = vpop.f32.mrf.mxu1 }
 0x296   : > { %v540_v61 = vadd.f32 %v539_v53, %v493_v57 }
 0x297   : > { %v748_v58 = vpop.f32.mrf.mxu1 }
 0x299   : > { %v496_v59 = vpop.f32.mrf.mxu1 }
 0x29b   : > { %v749_v60 = vpop.f32.mrf.mxu1 }
 0x29d   : > { %v588_v62 = vpop.f32.mrf.mxu1 }
 0x29e   : > { %v594_v63 = vadd.f32 %v588_v62, %v540_v61 }
 0x29f   : > { %v760_v0 = vpop.f32.mrf.mxu1 }
 0x2a0   : > { %v595_v1 = vsel %vm438_vm5, %v594_v63, 0.0 }
 0x2a1   : > { %v591_v2 = vpop.f32.mrf.mxu1  ;;  %v597_v3 = vsel %vm596_vm6, %v595_v1, 0.0 }
 0x2a2   : > { %598 = vadd.xlane.f32.xlu0 %v597_v3 }
 0x2a3   : > { %v761_v4 = vpop.f32.mrf.mxu1 }
 0x32b   : > { %v599_v5 = vpop.xlane.xlu0 %598 }
 0x32c   : > { %v600_v6 = vmul.f32 0.0625, %v599_v5 }
 0x32e   : > { %v601_v7 = vsub.f32 %v594_v63, %v600_v6  ;;  %608 = vst.msk [vmem:[%s253_s25] sm:$0xf] %vm607_vm7, %v600_v6 }
 0x330   : > { %v602_v8 = vsel %vm438_vm5, %v601_v7, 0.0 }
 0x331   : > { %v603_v10 = vmul.f32 %v602_v8, %v602_v8 }
 0x333   : > { %v604_v11 = vsel %vm596_vm6, %v603_v10, 0.0 }
 0x334   : > { %605 = vadd.xlane.f32.xlu1 %v604_v11 }
 0x3bd   : > { %v606_v12 = vpop.xlane.xlu1 %605 }
 0x3be   : > { %609 = vst.msk [vmem:[%s257_s28] sm:$0xf] %vm607_vm7, %v606_v12 }
 0x3bf PF: > { %s17_s21 = sadd.s32 1, %s783_s21  }
 0x3c0   : > { %p14_p4 = scmp.ge.s32.totalorder %s17_s21, 4  }
 0x3c2   :  { %16 = sbr.rel (!%p14_p4) target bundleno = 1 (0x1), region = 86 }

</bundles_post_ra>
